<compile_context>
chip_gen: v7x
topology: tpu7x:2x2x1
jax: 0.10.0
libtpu: 0.0.40
codegen_flags: <defaults>
</compile_context>

<pallas_src>
import functools

import jax
import jax.numpy as jnp
from jax.experimental import pallas as pl
from jax.experimental.pallas import tpu as pltpu


def _round_up(x: int, m: int) -> int:
    return ((x + m - 1) // m) * m


def _vmem_capacity_bytes() -> int:
    """Physical per-core VMEM, with safe fallbacks."""
    try:
        info = pltpu.get_tpu_info()
        cap = int(getattr(info, "vmem_capacity_bytes"))
        if cap > 0:
            return cap
    except Exception:
        pass
    try:
        kind = jax.devices()[0].device_kind.lower()
        if "v7" in kind:
            return 64 * 1024 * 1024
    except Exception:
        pass
    return 128 * 1024 * 1024


def _num_tensorcores() -> int:
    """Cores to shard the leading grid axis over (1 on single-TC v5e/v6e)."""
    try:
        kind = jax.devices()[0].device_kind.lower()
    except Exception:
        return 1
    if "lite" in kind or "v5e" in kind or "v6e" in kind:
        return 1
    if "v7" in kind or "v4" in kind or "v5p" in kind:
        return 2
    return 1


def _focal_nll_kernel(logits_ref, tgt_ref, out_ref, acc_ref, *,
                      n_rows: int, block_n: int, blocks_per_core: int):
    """Accumulate sum of per-row NLL over this core's batch tiles."""
    p = pl.program_id(0)   # core (parallel) axis
    j = pl.program_id(1)   # sequential reduction axis over batch tiles

    @pl.when(j == 0)
    def _():
        acc_ref[...] = jnp.zeros_like(acc_ref)

    x = logits_ref[...].astype(jnp.float32)            # (block_n, C) f32
    t = tgt_ref[...]                                    # (block_n, 1) int32
    bn, c = x.shape

    # Numerically-stable log-softmax.  The target logit is gathered from x
    # directly (iota-compare select; no dynamic gather on TPU) so that
    # (x - m) is single-use and streams through vregs.
    m = jnp.max(x, axis=-1, keepdims=True)                              # (bn,1)
    col = jax.lax.broadcasted_iota(jnp.int32, (bn, c), 1)
    x_t = jnp.sum(jnp.where(col == t, x, 0.0), axis=-1, keepdims=True)  # (bn,1)
    lse = m + jnp.log(jnp.sum(jnp.exp(x - m), axis=-1, keepdims=True))  # (bn,1)
    nll = lse - x_t                                                     # (bn,1)

    # Mask rows past the true batch size (padded last tile / clamped tiles).
    # Select (not multiply) so garbage NaN/Inf from padded HBM never leaks.
    block_idx = p * blocks_per_core + j
    row = block_idx * block_n + jax.lax.broadcasted_iota(jnp.int32, (bn, 1), 0)
    nll = jnp.where(row < n_rows, nll, 0.0)

    # Tiny scalar accumulator: per-tile sublane reduce (XLU, hidden under the
    # DMA) instead of a (block_n,1) lane-sparse accumulate.
    acc_ref[...] = acc_ref[...] + jnp.sum(nll)

    @pl.when(j == blocks_per_core - 1)
    def _():
        partial = jnp.sum(acc_ref[...])                 # this core's sum(NLL)
        out_ref[...] = jnp.full(out_ref.shape, partial, dtype=out_ref.dtype)


def focal_loss(logits: jax.Array, target: jax.Array, gamma: float = 0.0,
               eps: float = 1e-07) -> jax.Array:
    """Pallas implementation of FocalLoss.forward.

    logits: [N, C] float (any float dtype, passed through un-cast),
    target: [N] int class indices.  Returns scalar float32.
    `eps` is accepted for parity with the PyTorch module but (like the
    original forward pass) unused.
    """
    del eps  # unused in the original forward as well
    n, c = logits.shape
    tgt2d = target.astype(jnp.int32).reshape(n, 1)

    itemsize = jnp.dtype(logits.dtype).itemsize
    # Sublane granularity per dtype: 8 for f32, 16 for bf16, 32 for int8/fp8.
    sublane = max(8, 32 // max(1, itemsize))

    # Generation-aware VMEM budgeting.
    vmem_cap = _vmem_capacity_bytes()
    vmem_limit = (48 * 1024 * 1024 if vmem_cap <= 64 * 1024 * 1024
                  else 64 * 1024 * 1024)
    budget = (vmem_limit * 3) // 4          # headroom for compiler scratch
    # Per-row pipeline footprint: double-buffered native tile + ~3 tiles worth
    # of f32 elementwise temporaries (cast / exp chain / iota-select).
    bytes_per_row = 2 * c * itemsize + 3 * c * 4
    block_n = budget // max(1, bytes_per_row)
    block_n = min(int(block_n), 4096, _round_up(n, sublane))
    block_n = max(sublane, (block_n // sublane) * sublane)
    # TODO(synk): tile over C with online log-sum-exp for vocab-scale C.

    total_blocks = pl.cdiv(n, block_n)
    num_cores = _num_tensorcores() if total_blocks >= 2 else 1
    blocks_per_core = pl.cdiv(total_blocks, num_cores)

    def in_map(p, j):
        b = p * blocks_per_core + j
        # Clamp fully out-of-range tiles to the last real block; their rows
        # are masked out inside the kernel anyway.
        return (jnp.minimum(b, total_blocks - 1), 0)

    kernel = functools.partial(_focal_nll_kernel, n_rows=n, block_n=block_n,
                               blocks_per_core=blocks_per_core)

    partial_sums = pl.pallas_call(
        kernel,
        out_shape=jax.ShapeDtypeStruct((num_cores, 8, 128), jnp.float32),
        grid_spec=pltpu.PrefetchScalarGridSpec(
            num_scalar_prefetch=0,
            grid=(num_cores, blocks_per_core),
            in_specs=[
                pl.BlockSpec((block_n, c), in_map),   # logits tile (native dtype)
                pl.BlockSpec((block_n, 1), in_map),   # target column tile
            ],
            out_specs=pl.BlockSpec((1, 8, 128), lambda p, j: (p, 0, 0)),
            scratch_shapes=[pltpu.VMEM((1, 1), jnp.float32)],
        ),
        compiler_params=pltpu.CompilerParams(
            dimension_semantics=("parallel", "arbitrary"),
            vmem_limit_bytes=int(vmem_limit),
        ),
    )(logits, tgt2d)

    # Tiny scalar tail in the wrapper: mean over true N + focal re-weighting
    # of the scalar mean CE, exactly as the PyTorch module does.
    total_nll = jnp.sum(partial_sums[:, 0, 0])
    logp = total_nll / jnp.float32(n)
    p_conf = jnp.exp(-logp)
    return jnp.power(1.0 - p_conf, jnp.float32(gamma)) * logp


def _focal_loss_ref(logits, target, gamma=0.0):
    # Pure-JAX reference for a sanity check.
    logits = logits.astype(jnp.float32)
    logz = jax.nn.log_softmax(logits, axis=-1)
    nll = -jnp.take_along_axis(logz, target.reshape(-1, 1), axis=-1)
    logp = jnp.mean(nll)
    p = jnp.exp(-logp)
    return jnp.power(1.0 - p, gamma) * logp


if __name__ == "__main__":
    key = jax.random.PRNGKey(0)
    k1, k2, k3, k4, k5, k6, k7, k8 = jax.random.split(key, 8)

    # Small case matching the module's 2-D CrossEntropy convention.
    N1, C1 = 8, 32
    logits1 = jax.random.normal(k1, (N1, C1), dtype=jnp.float32)
    target1 = jax.random.randint(k2, (N1,), 0, C1, dtype=jnp.int32)

    # Moderate case: masking of the padded tail rows (2500 not sublane-exact).
    N2, C2 = 2500, 256
    logits2 = jax.random.normal(k3, (N2, C2), dtype=jnp.float32)
    target2 = jax.random.randint(k4, (N2,), 0, C2, dtype=jnp.int32)

    # Multi-tile case: exercises the batch-tile grid (and core split / tile
    # clamping on multi-TensorCore chips).
    N3, C3 = 9000, 128
    logits3 = jax.random.normal(k5, (N3, C3), dtype=jnp.float32)
    target3 = jax.random.randint(k6, (N3,), 0, C3, dtype=jnp.int32)

    # bf16 case: native-dtype streaming with 16-row sublane alignment.
    N4, C4 = 1000, 96
    logits4 = jax.random.normal(k7, (N4, C4), dtype=jnp.float32).astype(jnp.bfloat16)
    target4 = jax.random.randint(k8, (N4,), 0, C4, dtype=jnp.int32)

    cases = ((logits1, target1), (logits2, target2),
             (logits3, target3), (logits4, target4))
    for (lg, tg) in cases:
        for gamma in (0.0, 2.0):   # default gamma=0, plus a non-trivial one
            out = jax.block_until_ready(focal_loss(lg, tg, gamma=gamma))
            ref = _focal_loss_ref(lg, tg, gamma=gamma)
            assert jnp.allclose(out, ref, rtol=1e-4, atol=1e-5), (gamma, out, ref)

    print("KERNEL_OK")
</pallas_src>

<mosaic_0001>
module attributes {stable_mosaic.version = 11 : i64} {
  func.func @_focal_nll_kernel(%arg0: i32, %arg1: i32, %arg2: memref<8x32xf32, #tpu.memory_space<vmem>>, %arg3: memref<8x1xi32, #tpu.memory_space<vmem>>, %arg4: memref<1x8x128xf32, #tpu.memory_space<vmem>>, %arg5: memref<1x1xf32, #tpu.memory_space<vmem>>) attributes {dimension_semantics = [#tpu.dimension_semantics<parallel>, #tpu.dimension_semantics<arbitrary>], iteration_bounds = array<i64: 1, 1>, scalar_prefetch = 0 : i64, scratch_operands = 1 : i64, tpu.core_type = #tpu.core_type<tc>, window_params = [{transform_indices = @transform_0, window_bounds = array<i64: 8, 32>}, {transform_indices = @transform_1, window_bounds = array<i64: 8, 1>}, {transform_indices = @transform_2, window_bounds = array<i64: 1, 8, 128>}]} {
    %c0_i32 = arith.constant 0 : i32
    %0 = arith.cmpi eq, %arg1, %c0_i32 : i32
    %1 = arith.extui %0 : i1 to i32
    %c0_i32_0 = arith.constant 0 : i32
    %2 = arith.cmpi ne, %1, %c0_i32_0 : i32
    scf.if %2 {
      %cst_16 = arith.constant 0.000000e+00 : f32
      %43 = vector.broadcast %cst_16 : f32 to vector<1x1xf32>
      %c0_17 = arith.constant 0 : index
      %c0_18 = arith.constant 0 : index
      %44 = vector.load %arg5[%c0_17, %c0_18] : memref<1x1xf32, #tpu.memory_space<vmem>>, vector<1x1xf32>
      tpu.vector_store %arg5[%c0_17, %c0_18], %43 {strides = array<i32>} : memref<1x1xf32, #tpu.memory_space<vmem>>, vector<1x1xf32>,
    } else {
    }
    %c0 = arith.constant 0 : index
    %c0_1 = arith.constant 0 : index
    %3 = vector.load %arg2[%c0, %c0_1] : memref<8x32xf32, #tpu.memory_space<vmem>>, vector<8x32xf32>
    %c0_2 = arith.constant 0 : index
    %c0_3 = arith.constant 0 : index
    %4 = vector.load %arg3[%c0_2, %c0_3] : memref<8x1xi32, #tpu.memory_space<vmem>>, vector<8x1xi32>
    %cst = arith.constant dense<0xFF800000> : vector<8xf32>
    %5 = vector.multi_reduction <maximumf>, %3, %cst [1] : vector<8x32xf32> to vector<8xf32>
    %6 = vector.shape_cast %5 : vector<8xf32> to vector<8x1xf32>
    %7 = tpu.iota {dimensions = array<i32: 1>} : vector<8x32xi32>
    %8 = vector.broadcast %4 : vector<8x1xi32> to vector<8x32xi32>
    %9 = arith.cmpi eq, %7, %8 : vector<8x32xi32>
    %cst_4 = arith.constant 0.000000e+00 : f32
    %10 = vector.broadcast %cst_4 : f32 to vector<8x32xf32>
    %11 = arith.select %9, %3, %10 : vector<8x32xi1>, vector<8x32xf32>
    %cst_5 = arith.constant dense<0.000000e+00> : vector<8xf32>
    %12 = vector.multi_reduction <add>, %11, %cst_5 [1] : vector<8x32xf32> to vector<8xf32>
    %13 = vector.shape_cast %12 : vector<8xf32> to vector<8x1xf32>
    %14 = vector.broadcast %6 : vector<8x1xf32> to vector<8x32xf32>
    %15 = arith.subf %3, %14 : vector<8x32xf32>
    %16 = math.exp %15 : vector<8x32xf32>
    %cst_6 = arith.constant dense<0.000000e+00> : vector<8xf32>
    %17 = vector.multi_reduction <add>, %16, %cst_6 [1] : vector<8x32xf32> to vector<8xf32>
    %18 = vector.shape_cast %17 : vector<8xf32> to vector<8x1xf32>
    %19 = math.log %18 : vector<8x1xf32>
    %20 = arith.addf %6, %19 : vector<8x1xf32>
    %21 = arith.subf %20, %13 : vector<8x1xf32>
    %c1_i32 = arith.constant 1 : i32
    %22 = arith.muli %arg0, %c1_i32 : i32
    %23 = arith.addi %22, %arg1 : i32
    %c8_i32 = arith.constant 8 : i32
    %24 = arith.muli %23, %c8_i32 : i32
    %25 = tpu.iota {dimensions = array<i32: 0>} : vector<8x1xi32>
    %26 = vector.broadcast %24 : i32 to vector<8x1xi32>
    %27 = arith.addi %26, %25 : vector<8x1xi32>
    %c8_i32_7 = arith.constant 8 : i32
    %28 = vector.broadcast %c8_i32_7 : i32 to vector<8x1xi32>
    %29 = arith.cmpi slt, %27, %28 : vector<8x1xi32>
    %cst_8 = arith.constant 0.000000e+00 : f32
    %30 = vector.broadcast %cst_8 : f32 to vector<8x1xf32>
    %31 = arith.select %29, %21, %30 : vector<8x1xi1>, vector<8x1xf32>
    %c0_9 = arith.constant 0 : index
    %c0_10 = arith.constant 0 : index
    %32 = vector.load %arg5[%c0_9, %c0_10] : memref<1x1xf32, #tpu.memory_space<vmem>>, vector<1x1xf32>
    %33 = vector.shape_cast %31 : vector<8x1xf32> to vector<1x8x1xf32>
    %cst_11 = arith.constant dense<0.000000e+00> : vector<1xf32>
    %34 = vector.multi_reduction <add>, %33, %cst_11 [1, 2] : vector<1x8x1xf32> to vector<1xf32>
    %35 = vector.shape_cast %34 : vector<1xf32> to vector<1x1x1xf32>
    %36 = vector.extract %35[0, 0, 0] : f32 from vector<1x1x1xf32>
    %37 = vector.broadcast %36 : f32 to vector<1x1xf32>
    %38 = arith.addf %32, %37 : vector<1x1xf32>
    %c0_12 = arith.constant 0 : index
    %c0_13 = arith.constant 0 : index
    %39 = vector.load %arg5[%c0_12, %c0_13] : memref<1x1xf32, #tpu.memory_space<vmem>>, vector<1x1xf32>
    tpu.vector_store %arg5[%c0_12, %c0_13], %38 {strides = array<i32>} : memref<1x1xf32, #tpu.memory_space<vmem>>, vector<1x1xf32>,
    %c0_i32_14 = arith.constant 0 : i32
    %40 = arith.cmpi eq, %arg1, %c0_i32_14 : i32
    %41 = arith.extui %40 : i1 to i32
    %c0_i32_15 = arith.constant 0 : i32
    %42 = arith.cmpi ne, %41, %c0_i32_15 : i32
    scf.if %42 {
      %c0_16 = arith.constant 0 : index
      %c0_17 = arith.constant 0 : index
      %43 = vector.load %arg5[%c0_16, %c0_17] : memref<1x1xf32, #tpu.memory_space<vmem>>, vector<1x1xf32>
      %44 = vector.shape_cast %43 : vector<1x1xf32> to vector<1x1x1xf32>
      %cst_18 = arith.constant dense<0.000000e+00> : vector<1xf32>
      %45 = vector.multi_reduction <add>, %44, %cst_18 [1, 2] : vector<1x1x1xf32> to vector<1xf32>
      %46 = vector.shape_cast %45 : vector<1xf32> to vector<1x1x1xf32>
      %47 = vector.extract %46[0, 0, 0] : f32 from vector<1x1x1xf32>
      %48 = vector.broadcast %47 : f32 to vector<1x8x128xf32>
      %c0_19 = arith.constant 0 : index
      %c0_20 = arith.constant 0 : index
      %c0_21 = arith.constant 0 : index
      %49 = vector.load %arg4[%c0_19, %c0_20, %c0_21] : memref<1x8x128xf32, #tpu.memory_space<vmem>>, vector<1x8x128xf32>
      tpu.vector_store %arg4[%c0_19, %c0_20, %c0_21], %48 {strides = array<i32>} : memref<1x8x128xf32, #tpu.memory_space<vmem>>, vector<1x8x128xf32>,
    } else {
    }
    return
  }
  func.func @transform_0(%arg0: i32, %arg1: i32) -> (i32, i32) {
    %c1_i32 = arith.constant 1 : i32
    %0 = arith.muli %arg0, %c1_i32 : i32
    %1 = arith.addi %0, %arg1 : i32
    %c0_i32 = arith.constant 0 : i32
    %2 = arith.minsi %1, %c0_i32 : i32
    %c0_i32_0 = arith.constant 0 : i32
    %c0_i32_1 = arith.constant 0 : i32
    return %2, %c0_i32_0 : i32, i32
  }
  func.func @transform_1(%arg0: i32, %arg1: i32) -> (i32, i32) {
    %c1_i32 = arith.constant 1 : i32
    %0 = arith.muli %arg0, %c1_i32 : i32
    %1 = arith.addi %0, %arg1 : i32
    %c0_i32 = arith.constant 0 : i32
    %2 = arith.minsi %1, %c0_i32 : i32
    %c0_i32_0 = arith.constant 0 : i32
    %c0_i32_1 = arith.constant 0 : i32
    return %2, %c0_i32_0 : i32, i32
  }
  func.func @transform_2(%arg0: i32, %arg1: i32) -> (i32, i32, i32) {
    %c0_i32 = arith.constant 0 : i32
    %c0_i32_0 = arith.constant 0 : i32
    %c0_i32_1 = arith.constant 0 : i32
    return %arg0, %c0_i32, %c0_i32_0 : i32, i32, i32
  }
}

</mosaic_0001>

<bundles_post_ra>
// kernel: tpu_custom_call.1
= control target key start
LH: loop header
LB: loop body
LE: loop exit
PB: predicated region body
PF: predicated region fallthrough
CT: control target
= control target key end

     0   :  { %7 = vsyncpa [#allocation4], 0  ;;  %s281_s0 = inlined_call_operand.hbm [shape: f32[8,32], index: 0, kind: input, shape index: {}]   ;;  %s282_s1 = inlined_call_operand.hbm [shape: s32[8,1], index: 1, kind: input, shape index: {}]   ;;  %s283_s2 = inlined_call_operand.hbm [shape: f32[1,8,128], index: 2, kind: output, shape index: {}]  }
   0x1   :  { %8 = vsyncpa [#allocation7], 0 }
   0x2   :  { %9 = vsyncpa [#allocation5], 0  ;;  %s222_s9 = smov [#allocation3]   ;;  %s223_s11 = smov [#allocation6]  }
   0x3   :  { %s21_s10 = sshll.u32 %s222_s9, 4  ;;  %s36_s12 = sshll.u32 %s223_s11, 4  ;;  %s22_s10 = int_to_ptr.vmem [resolvable:$true] %s21_s10  ;;  %s37_s12 = int_to_ptr.vmem [resolvable:$true] %s36_s12 }
   0x4   :  { %s150_s15 = scalar_lea.hbm %s281_s0, 128 }
   0x5   :  { %p151_p0 = scmp.ne.s32.totalorder %s281_s0, %s150_s15  ;;  %p154_p1 = scmp.lt.u32.totalorder %s150_s15, %s281_s0 }
   0x7   :  { %p156_p2 = pnand %p154_p1, %p151_p0 }
   0x9   :  { %159 = shalt.err (!%p156_p2)
}
   0xa   :  { %s160_s20 = scalar_lea.vmem %s22_s10, 128  ;;  %p165_p4 = scmp.lt.s32.totalorder %s22_s10, %s22_s10 }
   0xb   :  { %p161_p3 = scmp.ne.s32.totalorder %s22_s10, %s160_s20  ;;  %p166_p5 = scmp.lt.s32.totalorder %s160_s20, %s160_s20 }
   0xd   :  { %p167_p6 = por %p166_p5, %p165_p4 }
   0xf   :  { %p168_p7 = pnand %p167_p6, %p161_p3 }
  0x11   :  { %171 = shalt.err (!%p168_p7)
}
  0x12   :  { %24 = dma.hbm_to_vmem [thread:$0]  %s281_s0, 128, %s22_s10, [#allocation4]  }
  0x13   :  { %s172_s25 = scalar_lea.hbm %s282_s1, 128 }
  0x14   :  { %p173_p8 = scmp.ne.s32.totalorder %s282_s1, %s172_s25  ;;  %p176_p9 = scmp.lt.u32.totalorder %s172_s25, %s282_s1 }
  0x16   :  { %p178_p10 = pnand %p176_p9, %p173_p8 }
  0x18   :  { %181 = shalt.err (!%p178_p10)
}
  0x19   :  { %s182_s30 = scalar_lea.vmem %s37_s12, 128  ;;  %p187_p12 = scmp.lt.s32.totalorder %s37_s12, %s37_s12 }
  0x1a   :  { %p183_p11 = scmp.ne.s32.totalorder %s37_s12, %s182_s30  ;;  %p188_p13 = scmp.lt.s32.totalorder %s182_s30, %s182_s30 }
  0x1c   :  { %p189_p0 = por %p188_p13, %p187_p12 }
  0x1e   :  { %p190_p1 = pnand %p189_p0, %p183_p11 }
  0x20   :  { %193 = shalt.err (!%p190_p1)
}
  0x21   :  { %39 = dma.hbm_to_vmem [thread:$0]  %s282_s1, 128, %s37_s12, [#allocation7]  }
  0x22   :  { %216 = dma.done.wait [#allocation4], 128  }
  0x23   :  { %217 = vsyncadd [#allocation4], 4294967168 }
  0x24   :  { %218 = dma.done.wait [#allocation7], 128  }
  0x25   :  { %219 = vsyncadd [#allocation7], 4294967168  ;;  %v224_v0 = vmov 0   ;;  %vm60_vm0 = vcmask 261120   ;;  %v58_v1 = vld [vmem:[#allocation3] sm:$0xff]  ;;  %v59_v3 = vld [vmem:[#allocation6] sm:$0xff]  ;;  %v64_v7 = vlaneseq }
  0x26   :  { %145 = vset.pattern.permute.xlu0 %v224_v0  ;;  %v61_v2 = vsel %vm60_vm0, %v58_v1, -inf  ;;  %vm93_vm2 = vcmask 7168   ;;  %vm56_vm3 = vcmask 0   ;;  %v225_v21 = vmov 0.0   ;;  %s226_s4 = smov [#allocation8]  }
  0x27   :  { %62 = vmax.xlane.f32.xlu0 %v61_v2  ;;  %v65_v8 = vand.u32 127, %v64_v7  ;;  %57 = vst.msk [vmem:[#allocation2] sm:$0x1] %vm56_vm3, %v225_v21  ;;  %s122_s5 = sshll.u32 %s226_s4, 4  ;;  %s123_s5 = int_to_ptr.vmem [resolvable:$true] %s122_s5 }
  0x28   :  { %s194_s7 = scalar_lea.vmem %s123_s5, 128  ;;  %p199_p3 = scmp.lt.s32.totalorder %s123_s5, %s123_s5 }
  0x29   :  { %p195_p2 = scmp.ne.s32.totalorder %s123_s5, %s194_s7  ;;  %p200_p4 = scmp.lt.s32.totalorder %s194_s7, %s194_s7 }
  0x2b   :  { %p201_p5 = por %p200_p4, %p199_p3 }
  0x2d   :  { %p202_p6 = pnand %p201_p5, %p195_p2 }
  0x2e   :  { %v92_v29 = vld [vmem:[#allocation2] sm:$0x1] }
  0x3d   :  { %67 = vperm.xlu0 %145, %v59_v3  }
  0xb4   :  { %v63_v4 = vpop.xlane.xlu0 %62 }
  0xb5   :  { %v74_v5 = vsub.f32 %v58_v1, %v63_v4 }
  0xb7   :  { %v75_v6 = vmul.f32 1.442695, %v74_v5 }
  0xb9   :  { %146 = vpow2.f32 %v75_v6 }
  0xbc   :  { %v68_v9 = vpop.permute.xlu0 %67 }
  0xbd   :  { %vm69_vm1 = vcmp.eq.s32.totalorder %v65_v8, %v68_v9 }
  0xbe   :  { %v70_v11 = vsel %vm69_vm1, %v58_v1, 0.0 }
  0xbf   :  { %v71_v13 = vsel %vm60_vm0, %v70_v11, 0.0 }
  0xc3   :  { %v147_v10 = vpop.eup %146 }
  0xc4   :  { %v77_v12 = vsel %vm60_vm0, %v147_v10, 0.0 }
  0xc5   :  { %78 = vadd.xlane.f32.xlu1 %v77_v12 }
  0xc9   :  { %72 = vadd.xlane.f32.xlu1 %v71_v13 }
 0x152   :  { %v79_v14 = vpop.xlane.xlu1 %78 }
 0x153   :  { %148 = vlog2.f32 %v79_v14 }
 0x156   :  { %v73_v17 = vpop.xlane.xlu1 %72 }
 0x15d   :  { %v149_v15 = vpop.eup %148 }
 0x15e   :  { %v81_v16 = vmul.f32 0.6931472, %v149_v15 }
 0x160   :  { %v82_v18 = vadd.f32 %v81_v16, %v63_v4 }
 0x162   :  { %v83_v19 = vsub.f32 %v82_v18, %v73_v17 }
 0x164   :  { %v94_v20 = vsel %vm93_vm2, %v83_v19, 0.0 }
 0x165   :  { %95 = vadd.xlane.f32.xlu1 %v94_v20 }
 0x1f2   :  { %v96_v22 = vpop.xlane.xlu1 %95 }
 0x1f3   :  { %v97_v23 = vrot.slane %v96_v22, 4 }
 0x1f5   :  { %v98_v24 = vadd.f32 %v97_v23, %v96_v22 }
 0x1f7   :  { %v99_v25 = vrot.slane %v98_v24, 2 }
 0x1f9   :  { %v100_v26 = vadd.f32 %v99_v25, %v98_v24 }
 0x1fb   :  { %v101_v27 = vrot.slane %v100_v26, 1 }
 0x1fd   :  { %v102_v28 = vadd.f32 %v101_v27, %v100_v26 }
 0x1ff   :  { %136 = vpush %v102_v28 }
 0x230   :  { %s137_s1 = spop %136 }
 0x231   :  { %v104_v30 = vstv %s137_s1 }
 0x232   :  { %v105_v31 = vadd.f32 %v104_v30, %v92_v29 }
 0x234   :  { %107 = vst.msk [vmem:[#allocation2] sm:$0x1] %vm56_vm3, %v105_v31 }
 0x23b   :  { %v111_v32 = vld [vmem:[#allocation2] sm:$0x1] }
 0x23c   :  { %138 = vpush %v111_v32 }
 0x26d   :  { %s139_s6 = spop %138 }
 0x26e   :  { %v114_v33 = vstv %s139_s6 }
 0x26f   :  { %115 = vst [vmem:[#allocation8] sm:$0xff] %v114_v33 }
 0x270   :  { %205 = shalt.err (!%p202_p6)
}
 0x271   :  { %s206_s10 = scalar_lea.hbm %s283_s2, 128 }
 0x272   :  { %p207_p7 = scmp.ne.s32.totalorder %s283_s2, %s206_s10  ;;  %p210_p8 = scmp.lt.u32.totalorder %s206_s10, %s283_s2 }
 0x274   :  { %p212_p9 = pnand %p210_p8, %p207_p7 }
 0x276   :  { %215 = shalt.err (!%p212_p9)
}
 0x277   :  { %125 = dma.vmem_to_hbm [thread:$0]  %s123_s5, 128, %s283_s2, [#allocation5]  }
 0x278   :  { %220 = dma.done.wait [#allocation5], 128  }
 0x279   :  { %221 = vsyncadd [#allocation5], 4294967168 }
 0x27a   :  { %129 = vsyncpa [#allocation4], 1 }
 0x27b   :  { %130 = vsyncpa [#allocation7], 1 }
 0x27c   :  { %131 = vsyncpa [#allocation5], 1 }

</bundles_post_ra>
